<compile_context>
chip_gen: v6e
topology: v6e:2x2x1
jax: 0.10.0
libtpu: 0.0.40
codegen_flags: <defaults>
</compile_context>

<pallas_src>
import jax
import jax.numpy as jnp
from jax import lax
from jax.experimental import pallas as pl
from jax.experimental.pallas import tpu as pltpu


def _round_up(x, m):
    return (x + m - 1) // m * m


def _hnn_kernel(ids_ref,   # VMEM (TB, S, 1) int32
                emb_ref,   # VMEM (V_pad, E_pad) param_dtype   (resident table)
                wh_ref,    # VMEM (E_pad, H_pad) param_dtype
                bh_ref,    # VMEM (1, H_pad)     f32
                wo_ref,    # VMEM (H_pad, O_pad) param_dtype
                bo_ref,    # VMEM (1, O_pad)     f32
                out_ref):  # VMEM (TB, O_pad)    f32
    tb, s, _ = ids_ref.shape
    v_pad = emb_ref.shape[0]
    inv_s = jnp.float32(1.0 / s)

    # ---- per-row vocab "count" matrix: counts[b, v] = #{s : ids[b,s]==v} / S ----
    # (lane-broadcast compare against an iota, sublane reduction over S; no DMAs)
    ids = ids_ref[...]                                                # (TB, S, 1)
    vocab_iota = lax.broadcasted_iota(jnp.int32, (tb, s, v_pad), 2)   # (TB, S, V_pad)
    eq = (ids == vocab_iota).astype(jnp.float32)                      # (TB, S, V_pad)
    counts = jnp.sum(eq, axis=1) * inv_s                              # (TB, V_pad)

    # ---- fused "embedding gather + mean over S" as one MXU matmul ----
    pooled = jnp.dot(counts.astype(emb_ref.dtype), emb_ref[...],
                     preferred_element_type=jnp.float32)              # (TB, E_pad)

    # ---- two dense layers + tanh; padded lanes stay 0 through tanh (exact) ----
    h = jnp.tanh(jnp.dot(pooled.astype(wh_ref.dtype), wh_ref[...],
                         preferred_element_type=jnp.float32) + bh_ref[...])
    o = jnp.tanh(jnp.dot(h.astype(wo_ref.dtype), wo_ref[...],
                         preferred_element_type=jnp.float32) + bo_ref[...])
    out_ref[...] = o.astype(out_ref.dtype)


def prepare_params(emb, w_hidden, b_hidden, w_output, b_output,
                   *, param_dtype=jnp.float32):
    """Pad / transpose parameters once (NOT per forward call).

    param_dtype=jnp.bfloat16 is recommended for production sizes on v6e/v7x
    (halves resident VMEM and HBM traffic; tanh/bias math stays f32)."""
    V, E = emb.shape
    H = w_hidden.shape[0]
    O = w_output.shape[0]
    V_pad = _round_up(V, 128)
    E_pad = _round_up(E, 128)
    H_pad = _round_up(H, 128)
    O_pad = _round_up(O, 128)

    emb_p = jnp.zeros((V_pad, E_pad), param_dtype).at[:V, :E].set(emb.astype(param_dtype))
    wh_t = jnp.zeros((E_pad, H_pad), param_dtype).at[:E, :H].set(w_hidden.T.astype(param_dtype))
    bh = jnp.zeros((1, H_pad), jnp.float32).at[0, :H].set(b_hidden.astype(jnp.float32))
    wo_t = jnp.zeros((H_pad, O_pad), param_dtype).at[:H, :O].set(w_output.T.astype(param_dtype))
    bo = jnp.zeros((1, O_pad), jnp.float32).at[0, :O].set(b_output.astype(jnp.float32))
    return {"emb": emb_p, "wh": wh_t, "bh": bh, "wo": wo_t, "bo": bo,
            "dims": (V, E, H, O)}


def hnn_forward(ids, params, *, batch_tile=None):
    """ids: int [B, S]; params: output of prepare_params()."""
    emb_p, wh_t, bh, wo_t, bo = (params["emb"], params["wh"], params["bh"],
                                 params["wo"], params["bo"])
    V, E, H, O = params["dims"]
    V_pad, E_pad = emb_p.shape
    H_pad = wh_t.shape[1]
    O_pad = wo_t.shape[1]
    B, S = ids.shape

    # Batch tile: up to 128 rows (full MXU M on v5e, >= half tile on v6e/v7x),
    # multiple of 8 for sublane alignment.
    if batch_tile is None:
        TB = min(128, _round_up(B, 8))
    else:
        TB = _round_up(batch_tile, 8)
    B_pad = _round_up(B, TB)
    n_tiles = B_pad // TB

    dsize = jnp.dtype(emb_p.dtype).itemsize
    emb_bytes = V_pad * E_pad * dsize
    eq_bytes = TB * S * V_pad * 4
    if emb_bytes > (16 << 20) or eq_bytes > (8 << 20):
        # TODO(synk): manual double-buffered DMA row-gather path
        # (memory_space=pl.ANY + pltpu.make_async_copy in a chunked fori_loop,
        # skipping padded rows) for vocab tables too large to keep in VMEM.
        raise NotImplementedError(
            "vocab/sequence too large for the VMEM-resident embedding path")

    # Token ids: clamp to the table (PyTorch nn.Embedding raises on OOB ids —
    # documented semantic difference).  Padded batch rows use id 0 and are
    # sliced off below.  Trailing unit dim keeps S on sublanes in-kernel.
    ids_pad = jnp.zeros((B_pad, S), jnp.int32).at[:B].set(ids.astype(jnp.int32))
    ids_pad = jnp.clip(ids_pad, 0, V - 1).reshape(B_pad, S, 1)

    # VMEM budget from the real buffers: double-buffered blocks + intermediates,
    # floor 16 MiB, cap 48 MiB (stays under v7x's 64 MiB physical VMEM per TC).
    resident = 2 * (TB * S * 4 + emb_bytes
                    + E_pad * H_pad * dsize + H_pad * 4
                    + H_pad * O_pad * dsize + O_pad * 4
                    + TB * O_pad * 4)
    intermediates = eq_bytes + 4 * TB * (V_pad + E_pad + H_pad + O_pad)
    vmem_limit = int(min(max(2 * (resident + intermediates), 16 << 20), 48 << 20))

    out_pad = pl.pallas_call(
        _hnn_kernel,
        out_shape=jax.ShapeDtypeStruct((B_pad, O_pad), jnp.float32),
        grid=(n_tiles,),
        in_specs=[
            pl.BlockSpec((TB, S, 1), lambda i: (i, 0, 0)),       # token ids
            pl.BlockSpec((V_pad, E_pad), lambda i: (0, 0)),      # embedding table (resident)
            pl.BlockSpec((E_pad, H_pad), lambda i: (0, 0)),      # W_h.T
            pl.BlockSpec((1, H_pad), lambda i: (0, 0)),          # b_h
            pl.BlockSpec((H_pad, O_pad), lambda i: (0, 0)),      # W_o.T
            pl.BlockSpec((1, O_pad), lambda i: (0, 0)),          # b_o
        ],
        out_specs=pl.BlockSpec((TB, O_pad), lambda i: (i, 0)),   # lane-dense store
        compiler_params=pltpu.CompilerParams(
            dimension_semantics=("parallel",),   # batch tiles independent (2 TCs on v7x)
            vmem_limit_bytes=vmem_limit,
        ),
    )(ids_pad, emb_p, wh_t, bh, wo_t, bo)

    return out_pad[:B, :O]


def init_params(key, vocab_size, embed_dim, hidden_dim, output_dim):
    k_emb, k_h, k_o = jax.random.split(key, 3)

    # nn.init.uniform_(embedding.weight, -0.001, 0.001)
    emb = jax.random.uniform(
        k_emb, (vocab_size, embed_dim), jnp.float32, -0.001, 0.001)

    def xavier_uniform(k, out_dim, in_dim, gain):
        bound = gain * jnp.sqrt(6.0 / (in_dim + out_dim))
        return jax.random.uniform(k, (out_dim, in_dim), jnp.float32, -bound, bound)

    w_hidden = xavier_uniform(k_h, hidden_dim, embed_dim, 0.01)   # [H, E]
    w_output = xavier_uniform(k_o, output_dim, hidden_dim, 0.01)  # [O, H]
    b_hidden = jnp.zeros((hidden_dim,), jnp.float32)
    b_output = jnp.zeros((output_dim,), jnp.float32)
    return emb, w_hidden, b_hidden, w_output, b_output


def hnn_reference(ids, emb, w_hidden, b_hidden, w_output, b_output):
    e = jnp.take(emb, ids, axis=0)          # [B, S, E]
    p = jnp.mean(e, axis=1)                 # [B, E]
    h = jnp.tanh(p @ w_hidden.T + b_hidden)
    return jnp.tanh(h @ w_output.T + b_output)


if __name__ == "__main__":
    vocab_size, embed_dim, hidden_dim, output_dim = 64, 32, 32, 16
    B, S = 2, 8

    key = jax.random.PRNGKey(0)
    k_params, k_ids, k_ids2 = jax.random.split(key, 3)
    raw = init_params(k_params, vocab_size, embed_dim, hidden_dim, output_dim)
    params = prepare_params(*raw)           # pad/transpose once, not per call
    ids = jax.random.randint(k_ids, (B, S), 0, vocab_size, dtype=jnp.int32)

    out = hnn_forward(ids, params)
    out = jax.block_until_ready(out)
    ref = hnn_reference(ids, *raw)
    assert out.shape == (B, output_dim)
    assert jnp.allclose(out, ref, atol=1e-5, rtol=1e-5), float(jnp.max(jnp.abs(out - ref)))

    # Multi-tile / larger-batch path (n_tiles > 1, padded final tile).
    B2 = 300
    ids2 = jax.random.randint(k_ids2, (B2, S), 0, vocab_size, dtype=jnp.int32)
    out2 = jax.block_until_ready(hnn_forward(ids2, params))
    ref2 = hnn_reference(ids2, *raw)
    assert out2.shape == (B2, output_dim)
    assert jnp.allclose(out2, ref2, atol=1e-5, rtol=1e-5), float(jnp.max(jnp.abs(out2 - ref2)))

    print("KERNEL_OK")
</pallas_src>

<mosaic_0001>
module attributes {stable_mosaic.version = 11 : i64} {
  func.func @_hnn_kernel(%arg0: i32, %arg1: memref<8x8x1xi32, #tpu.memory_space<vmem>>, %arg2: memref<128x128xf32, #tpu.memory_space<vmem>>, %arg3: memref<128x128xf32, #tpu.memory_space<vmem>>, %arg4: memref<1x128xf32, #tpu.memory_space<vmem>>, %arg5: memref<128x128xf32, #tpu.memory_space<vmem>>, %arg6: memref<1x128xf32, #tpu.memory_space<vmem>>, %arg7: memref<8x128xf32, #tpu.memory_space<vmem>>) attributes {dimension_semantics = [#tpu.dimension_semantics<parallel>], iteration_bounds = array<i64: 1>, scalar_prefetch = 0 : i64, scratch_operands = 0 : i64, tpu.core_type = #tpu.core_type<tc>, window_params = [{transform_indices = @transform_0, window_bounds = array<i64: 8, 8, 1>}, {pipeline_mode = #tpu.pipeline_mode<synchronous>, transform_indices = @transform_1, window_bounds = array<i64: 128, 128>}, {pipeline_mode = #tpu.pipeline_mode<synchronous>, transform_indices = @transform_2, window_bounds = array<i64: 128, 128>}, {pipeline_mode = #tpu.pipeline_mode<synchronous>, transform_indices = @transform_3, window_bounds = array<i64: 1, 128>}, {pipeline_mode = #tpu.pipeline_mode<synchronous>, transform_indices = @transform_4, window_bounds = array<i64: 128, 128>}, {pipeline_mode = #tpu.pipeline_mode<synchronous>, transform_indices = @transform_5, window_bounds = array<i64: 1, 128>}, {transform_indices = @transform_6, window_bounds = array<i64: 8, 128>}]} {
    %c0 = arith.constant 0 : index
    %c0_0 = arith.constant 0 : index
    %c0_1 = arith.constant 0 : index
    %0 = vector.load %arg1[%c0, %c0_0, %c0_1] : memref<8x8x1xi32, #tpu.memory_space<vmem>>, vector<8x8x1xi32>
    %1 = tpu.iota {dimensions = array<i32: 2>} : vector<8x8x128xi32>
    %2 = vector.broadcast %0 : vector<8x8x1xi32> to vector<8x8x128xi32>
    %3 = arith.cmpi eq, %2, %1 : vector<8x8x128xi32>
    %4 = arith.extui %3 : vector<8x8x128xi1> to vector<8x8x128xi32>
    %5 = arith.sitofp %4 : vector<8x8x128xi32> to vector<8x8x128xf32>
    %cst = arith.constant dense<0.000000e+00> : vector<8x128xf32>
    %6 = vector.multi_reduction <add>, %5, %cst [1] : vector<8x8x128xf32> to vector<8x128xf32>
    %cst_2 = arith.constant 1.250000e-01 : f32
    %7 = vector.broadcast %cst_2 : f32 to vector<8x128xf32>
    %8 = arith.mulf %6, %7 : vector<8x128xf32>
    %c0_3 = arith.constant 0 : index
    %c0_4 = arith.constant 0 : index
    %9 = vector.load %arg2[%c0_3, %c0_4] : memref<128x128xf32, #tpu.memory_space<vmem>>, vector<128x128xf32>
    %cst_5 = arith.constant dense<0.000000e+00> : vector<8x128xf32>
    %10 = tpu.matmul %8, %9, %cst_5 {dimension_numbers = #tpu.dot_dimension_numbers<[1], [0], [0], [1], [0, 0, 1, 1], [], []>} : vector<8x128xf32>, vector<128x128xf32>, vector<8x128xf32> -> vector<8x128xf32>
    %c0_6 = arith.constant 0 : index
    %c0_7 = arith.constant 0 : index
    %11 = vector.load %arg3[%c0_6, %c0_7] : memref<128x128xf32, #tpu.memory_space<vmem>>, vector<128x128xf32>
    %cst_8 = arith.constant dense<0.000000e+00> : vector<8x128xf32>
    %12 = tpu.matmul %10, %11, %cst_8 {dimension_numbers = #tpu.dot_dimension_numbers<[1], [0], [0], [1], [0, 0, 1, 1], [], []>} : vector<8x128xf32>, vector<128x128xf32>, vector<8x128xf32> -> vector<8x128xf32>
    %c0_9 = arith.constant 0 : index
    %c0_10 = arith.constant 0 : index
    %13 = vector.load %arg4[%c0_9, %c0_10] : memref<1x128xf32, #tpu.memory_space<vmem>>, vector<1x128xf32>
    %14 = vector.broadcast %13 : vector<1x128xf32> to vector<8x128xf32>
    %15 = arith.addf %12, %14 : vector<8x128xf32>
    %16 = math.tanh %15 : vector<8x128xf32>
    %c0_11 = arith.constant 0 : index
    %c0_12 = arith.constant 0 : index
    %17 = vector.load %arg5[%c0_11, %c0_12] : memref<128x128xf32, #tpu.memory_space<vmem>>, vector<128x128xf32>
    %cst_13 = arith.constant dense<0.000000e+00> : vector<8x128xf32>
    %18 = tpu.matmul %16, %17, %cst_13 {dimension_numbers = #tpu.dot_dimension_numbers<[1], [0], [0], [1], [0, 0, 1, 1], [], []>} : vector<8x128xf32>, vector<128x128xf32>, vector<8x128xf32> -> vector<8x128xf32>
    %c0_14 = arith.constant 0 : index
    %c0_15 = arith.constant 0 : index
    %19 = vector.load %arg6[%c0_14, %c0_15] : memref<1x128xf32, #tpu.memory_space<vmem>>, vector<1x128xf32>
    %20 = vector.broadcast %19 : vector<1x128xf32> to vector<8x128xf32>
    %21 = arith.addf %18, %20 : vector<8x128xf32>
    %22 = math.tanh %21 : vector<8x128xf32>
    %c0_16 = arith.constant 0 : index
    %c0_17 = arith.constant 0 : index
    %23 = vector.load %arg7[%c0_16, %c0_17] : memref<8x128xf32, #tpu.memory_space<vmem>>, vector<8x128xf32>
    tpu.vector_store %arg7[%c0_16, %c0_17], %22 {strides = array<i32>} : memref<8x128xf32, #tpu.memory_space<vmem>>, vector<8x128xf32>,
    return
  }
  func.func @transform_0(%arg0: i32) -> (i32, i32, i32) {
    %c0_i32 = arith.constant 0 : i32
    %c0_i32_0 = arith.constant 0 : i32
    %c0_i32_1 = arith.constant 0 : i32
    return %arg0, %c0_i32, %c0_i32_0 : i32, i32, i32
  }
  func.func @transform_1(%arg0: i32) -> (i32, i32) {
    %c0_i32 = arith.constant 0 : i32
    %c0_i32_0 = arith.constant 0 : i32
    %c0_i32_1 = arith.constant 0 : i32
    return %c0_i32, %c0_i32_0 : i32, i32
  }
  func.func @transform_2(%arg0: i32) -> (i32, i32) {
    %c0_i32 = arith.constant 0 : i32
    %c0_i32_0 = arith.constant 0 : i32
    %c0_i32_1 = arith.constant 0 : i32
    return %c0_i32, %c0_i32_0 : i32, i32
  }
  func.func @transform_3(%arg0: i32) -> (i32, i32) {
    %c0_i32 = arith.constant 0 : i32
    %c0_i32_0 = arith.constant 0 : i32
    %c0_i32_1 = arith.constant 0 : i32
    return %c0_i32, %c0_i32_0 : i32, i32
  }
  func.func @transform_4(%arg0: i32) -> (i32, i32) {
    %c0_i32 = arith.constant 0 : i32
    %c0_i32_0 = arith.constant 0 : i32
    %c0_i32_1 = arith.constant 0 : i32
    return %c0_i32, %c0_i32_0 : i32, i32
  }
  func.func @transform_5(%arg0: i32) -> (i32, i32) {
    %c0_i32 = arith.constant 0 : i32
    %c0_i32_0 = arith.constant 0 : i32
    %c0_i32_1 = arith.constant 0 : i32
    return %c0_i32, %c0_i32_0 : i32, i32
  }
  func.func @transform_6(%arg0: i32) -> (i32, i32) {
    %c0_i32 = arith.constant 0 : i32
    %c0_i32_0 = arith.constant 0 : i32
    return %arg0, %c0_i32 : i32, i32
  }
}

</mosaic_0001>

<bundles_post_ra>
// kernel: tpu_custom_call.1
= control target key start
LH: loop header
LB: loop body
LE: loop exit
PB: predicated region body
PF: predicated region fallthrough
CT: control target
= control target key end

     0   :  { %11 = vsyncpa [#allocation3], 0  ;;  %s908_s0 = inlined_call_operand.vmem [shape: s32[8,8,1], index: 0, kind: input, shape index: {}]   ;;  %s909_s1 = inlined_call_operand.hbm [shape: f32[128,128], index: 1, kind: input, shape index: {}]   ;;  %s910_s2 = inlined_call_operand.hbm [shape: f32[128,128], index: 2, kind: input, shape index: {}]   ;;  %s911_s3 = inlined_call_operand.vmem [shape: f32[1,128], index: 3, kind: input, shape index: {}]   ;;  %s912_s4 = inlined_call_operand.hbm [shape: f32[128,128], index: 4, kind: input, shape index: {}]   ;;  %s913_s5 = inlined_call_operand.vmem [shape: f32[1,128], index: 5, kind: input, shape index: {}]   ;;  %s914_s6 = inlined_call_operand.hbm [shape: f32[8,128], index: 6, kind: output, shape index: {}]  }
   0x1   :  { %12 = vsyncpa [#allocation6], 0 }
   0x2   :  { %13 = vsyncpa [#allocation4], 0  ;;  %s760_s21 = smov [#allocation5]   ;;  %s761_s23 = smov [#allocation2]  }
   0x3   :  { %s33_s22 = sshll.u32 %s760_s21, 4  ;;  %s21_s24 = sshll.u32 %s761_s23, 4  ;;  %s34_s22 = int_to_ptr.vmem [resolvable:$true] %s33_s22  ;;  %s22_s24 = int_to_ptr.vmem [resolvable:$true] %s21_s24 }
   0x4   :  { %s682_s25 = scalar_lea.vmem %s34_s22, 2048  ;;  %p687_p1 = scmp.lt.s32.totalorder %s34_s22, %s34_s22 }
   0x5   :  { %p683_p0 = scmp.ne.s32.totalorder %s34_s22, %s682_s25  ;;  %p688_p2 = scmp.lt.s32.totalorder %s682_s25, %s682_s25 }
   0x7   :  { %p689_p3 = por %p688_p2, %p687_p1 }
   0x9   :  { %p690_p4 = pnand %p689_p3, %p683_p0 }
   0xb   :  { %693 = shalt.err (!%p690_p4)
}
   0xc   :  { %s762_s26 = smov 128   ;;  %s763_s27 = smov 8  }
   0xd   :  { %39 = dma.hbm_to_vmem [thread:$0]  %s910_s2, 2048, %s34_s22, [#allocation6], %s762_s26, %s762_s26, %s763_s27  }
   0xe   :  { %s702_s30 = scalar_lea.vmem %s22_s24, 2048  ;;  %p707_p6 = scmp.lt.s32.totalorder %s22_s24, %s22_s24 }
   0xf   :  { %p703_p5 = scmp.ne.s32.totalorder %s22_s24, %s702_s30  ;;  %p708_p7 = scmp.lt.s32.totalorder %s702_s30, %s702_s30 }
  0x11   :  { %p709_p8 = por %p708_p7, %p707_p6 }
  0x13   :  { %p710_p9 = pnand %p709_p8, %p703_p5 }
  0x15   :  { %713 = shalt.err (!%p710_p9)
}
  0x16   :  { %27 = dma.hbm_to_vmem [thread:$0]  %s909_s1, 2048, %s22_s24, [#allocation3], %s762_s26, %s762_s26, %s763_s27  }
  0x17   :  { %s764_s9 = smov [#allocation7]  }
  0x18   :  { %s47_s10 = sshll.u32 %s764_s9, 4  ;;  %s48_s10 = int_to_ptr.vmem [resolvable:$true] %s47_s10 }
  0x19   :  { %s722_s11 = scalar_lea.vmem %s48_s10, 2048  ;;  %p727_p11 = scmp.lt.s32.totalorder %s48_s10, %s48_s10 }
  0x1a   :  { %p723_p10 = scmp.ne.s32.totalorder %s48_s10, %s722_s11  ;;  %p728_p12 = scmp.lt.s32.totalorder %s722_s11, %s722_s11 }
  0x1c   :  { %p729_p13 = por %p728_p12, %p727_p11 }
  0x1e   :  { %p730_p0 = pnand %p729_p13, %p723_p10 }
  0x20   :  { %733 = shalt.err (!%p730_p0)
}
  0x21   :  { %53 = dma.hbm_to_vmem [thread:$0]  %s912_s4, 2048, %s48_s10, [#allocation6], %s762_s26, %s762_s26, %s763_s27  }
  0x22   :  { %754 = dma.done.wait [#allocation3], 2048  }
  0x23   :  { %755 = vsyncadd [#allocation3], 4294965248 }
  0x24   :  { %756 = dma.done.wait [#allocation6], 4096  }
  0x25   :  { %757 = vsyncadd [#allocation6], 4294963200  ;;  %v765_v0 = vmov 0   ;;  %v766_v1 = vmov 0.0   ;;  %v67_v2 = vld [vmem:[%s908_s0 + $0x10] sm:$0xff]  ;;  %v65_v3 = vld [vmem:[%s908_s0] sm:$0xff]  ;;  %v73_v41 = vlaneseq }
  0x26   :  { %669 = vset.pattern.permute.xlu1 %v765_v0  ;;  %668 = vset.pattern.permute.xlu0 %v765_v0  ;;  %v68_v4 = vld [vmem:[%s908_s0 + $0x18] sm:$0xff]  ;;  %v66_v5 = vld [vmem:[%s908_s0 + $0x8] sm:$0xff]  ;;  %v193_v7 = vld [vmem:[#allocation2 + $0x70] sm:$0xff]  ;;  %vm767_vm0 = vmmov 0   ;;  %vm203_vm9 = vcmask 1041409   ;;  %vm205_vm10 = vcmask 1042434  }
  0x27   :  { %554 = vmatprep.subr.mxu0 %v766_v1  ;;  %589 = vmatprep.subr.mxu1 %v766_v1  ;;  %v194_v6 = vld [vmem:[#allocation2 + $0x78] sm:$0xff]  ;;  %v192_v8 = vld [vmem:[#allocation2 + $0x68] sm:$0xff]  ;;  %v69_v10 = vld [vmem:[%s908_s0 + $0x20] sm:$0xff]  ;;  %v74_v42 = vand.u32 127, %v73_v41  ;;  %vm207_vm11 = vcmask 1043459   ;;  %vm209_vm12 = vcmask 1044484  }
  0x28   :  { %82 = vperm.xlu1 %669, %v67_v2   ;;  %76 = vperm.xlu0 %668, %v65_v3   ;;  %v70_v9 = vld [vmem:[%s908_s0 + $0x28] sm:$0xff]  ;;  %v191_v11 = vld [vmem:[#allocation2 + $0x60] sm:$0xff]  ;;  %v72_v12 = vld [vmem:[%s908_s0 + $0x38] sm:$0xff]  ;;  %vm211_vm13 = vcmask 1045509   ;;  %vm213_vm14 = vcmask 1046534   ;;  %vm215_vm15 = vcmask 1047559  }
  0x29   :  { %555 = vmatpush3.msra.mxu0 %v194_v6  ;;  %v71_v13 = vld [vmem:[%s908_s0 + $0x30] sm:$0xff]  ;;  %v190_v14 = vld [vmem:[#allocation2 + $0x58] sm:$0xff]  ;;  %v188_v16 = vld [vmem:[#allocation2 + $0x48] sm:$0xff]  ;;  %586 = vmatprep.mubr.msk.f32.mxu0 %vm767_vm0, %v766_v1  ;;  %s768_s30 = smov [#allocation8]  }
  0x2a   :  { %556 = vmatprep.subr.mxu0 %v766_v1  ;;  %v189_v15 = vld [vmem:[#allocation2 + $0x50] sm:$0xff]  ;;  %v187_v17 = vld [vmem:[#allocation2 + $0x40] sm:$0xff]  ;;  %v186_v18 = vld [vmem:[#allocation2 + $0x38] sm:$0xff]  ;;  %621 = vmatprep.mubr.msk.f32.mxu1 %vm767_vm0, %v766_v1  ;;  %s483_s7 = sshll.u32 %s768_s30, 4  ;;  %s484_s7 = int_to_ptr.vmem [resolvable:$true] %s483_s7 }
  0x2b   :  { %557 = vmatpush3.msra.mxu0 %v193_v7  ;;  %v185_v19 = vld [vmem:[#allocation2 + $0x30] sm:$0xff]  ;;  %v184_v20 = vld [vmem:[#allocation2 + $0x28] sm:$0xff]  ;;  %v183_v21 = vld [vmem:[#allocation2 + $0x20] sm:$0xff]  ;;  %p739_p2 = scmp.lt.s32.totalorder %s484_s7, %s484_s7 }
  0x2c   :  { %85 = vperm.xlu1 %669, %v68_v4   ;;  %79 = vperm.xlu0 %668, %v66_v5   ;;  %v182_v22 = vld [vmem:[#allocation2 + $0x18] sm:$0xff]  ;;  %v181_v23 = vld [vmem:[#allocation2 + $0x10] sm:$0xff]  ;;  %v180_v26 = vld [vmem:[#allocation2 + $0x8] sm:$0xff] }
  0x2d   :  { %558 = vmatprep.subr.mxu0 %v766_v1  ;;  %v303_v24 = vld [vmem:[#allocation5 + $0x78] sm:$0xff]  ;;  %v302_v25 = vld [vmem:[#allocation5 + $0x70] sm:$0xff]  ;;  %v301_v27 = vld [vmem:[#allocation5 + $0x68] sm:$0xff] }
  0x2e   :  { %559 = vmatpush3.msra.mxu0 %v192_v8  ;;  %590 = vmatpush3.msra.mxu1 %v303_v24  ;;  %v179_v28 = vld [vmem:[#allocation2] sm:$0xff]  ;;  %v299_v30 = vld [vmem:[#allocation5 + $0x58] sm:$0xff]  ;;  %v298_v31 = vld [vmem:[#allocation5 + $0x50] sm:$0xff] }
  0x2f   :  { %560 = vmatprep.subr.mxu0 %v766_v1  ;;  %591 = vmatprep.subr.mxu1 %v766_v1  ;;  %v300_v29 = vld [vmem:[#allocation5 + $0x60] sm:$0xff]  ;;  %v297_v32 = vld [vmem:[#allocation5 + $0x48] sm:$0xff]  ;;  %v295_v34 = vld [vmem:[#allocation5 + $0x38] sm:$0xff] }
  0x30   :  { %91 = vperm.xlu1 %669, %v70_v9   ;;  %88 = vperm.xlu0 %668, %v69_v10   ;;  %v296_v33 = vld [vmem:[#allocation5 + $0x40] sm:$0xff]  ;;  %v294_v35 = vld [vmem:[#allocation5 + $0x30] sm:$0xff]  ;;  %v293_v36 = vld [vmem:[#allocation5 + $0x28] sm:$0xff] }
  0x31   :  { %561 = vmatpush3.msra.mxu0 %v191_v11  ;;  %592 = vmatpush3.msra.mxu1 %v302_v25  ;;  %v292_v37 = vld [vmem:[#allocation5 + $0x20] sm:$0xff]  ;;  %v291_v38 = vld [vmem:[#allocation5 + $0x18] sm:$0xff]  ;;  %v290_v39 = vld [vmem:[#allocation5 + $0x10] sm:$0xff] }
  0x32   :  { %562 = vmatprep.subr.mxu0 %v766_v1  ;;  %593 = vmatprep.subr.mxu1 %v766_v1  ;;  %v289_v40 = vld [vmem:[#allocation5 + $0x8] sm:$0xff] }
  0x33   :  { %563 = vmatpush3.msra.mxu0 %v190_v14  ;;  %594 = vmatpush3.msra.mxu1 %v301_v27 }
  0x34   :  { %97 = vperm.xlu1 %669, %v72_v12   ;;  %94 = vperm.xlu0 %668, %v71_v13  }
  0x35   :  { %564 = vmatprep.subr.mxu0 %v766_v1  ;;  %595 = vmatprep.subr.mxu1 %v766_v1 }
  0x36   :  { %565 = vmatpush3.msra.mxu0 %v189_v15  ;;  %596 = vmatpush3.msra.mxu1 %v300_v29 }
  0x37   :  { %566 = vmatprep.subr.mxu0 %v766_v1  ;;  %597 = vmatprep.subr.mxu1 %v766_v1 }
  0x38   :  { %567 = vmatpush3.msra.mxu0 %v188_v16  ;;  %598 = vmatpush3.msra.mxu1 %v299_v30 }
  0x39   :  { %568 = vmatprep.subr.mxu0 %v766_v1  ;;  %599 = vmatprep.subr.mxu1 %v766_v1 }
  0x3a   :  { %569 = vmatpush3.msra.mxu0 %v187_v17  ;;  %600 = vmatpush3.msra.mxu1 %v298_v31 }
  0x3b   :  { %570 = vmatprep.subr.mxu0 %v766_v1  ;;  %601 = vmatprep.subr.mxu1 %v766_v1 }
  0x3c   :  { %571 = vmatpush3.msra.mxu0 %v186_v18  ;;  %602 = vmatpush3.msra.mxu1 %v297_v32 }
  0x3d   :  { %572 = vmatprep.subr.mxu0 %v766_v1  ;;  %603 = vmatprep.subr.mxu1 %v766_v1 }
  0x3e   :  { %573 = vmatpush3.msra.mxu0 %v185_v19  ;;  %604 = vmatpush3.msra.mxu1 %v296_v33 }
  0x3f   :  { %574 = vmatprep.subr.mxu0 %v766_v1  ;;  %605 = vmatprep.subr.mxu1 %v766_v1 }
  0x40   :  { %575 = vmatpush3.msra.mxu0 %v184_v20  ;;  %606 = vmatpush3.msra.mxu1 %v295_v34 }
  0x41   :  { %576 = vmatprep.subr.mxu0 %v766_v1  ;;  %607 = vmatprep.subr.mxu1 %v766_v1 }
  0x42   :  { %577 = vmatpush3.msra.mxu0 %v183_v21  ;;  %608 = vmatpush3.msra.mxu1 %v294_v35 }
  0x43   :  { %578 = vmatprep.subr.mxu0 %v766_v1  ;;  %609 = vmatprep.subr.mxu1 %v766_v1 }
  0x44   :  { %579 = vmatpush3.msra.mxu0 %v182_v22  ;;  %610 = vmatpush3.msra.mxu1 %v293_v36 }
  0x45   :  { %580 = vmatprep.subr.mxu0 %v766_v1  ;;  %611 = vmatprep.subr.mxu1 %v766_v1 }
  0x46   :  { %581 = vmatpush3.msra.mxu0 %v181_v23  ;;  %612 = vmatpush3.msra.mxu1 %v292_v37 }
  0x47   :  { %582 = vmatprep.subr.mxu0 %v766_v1  ;;  %613 = vmatprep.subr.mxu1 %v766_v1 }
  0x48   :  { %583 = vmatpush3.msra.mxu0 %v180_v26  ;;  %614 = vmatpush3.msra.mxu1 %v291_v38 }
  0x49   :  { %584 = vmatprep.subr.mxu0 %v766_v1  ;;  %615 = vmatprep.subr.mxu1 %v766_v1 }
  0x4a   :  { %585 = vmatpush3.msra.mxu0 %v179_v28  ;;  %616 = vmatpush3.msra.mxu1 %v290_v39 }
  0x4b   :  { %624 = vmatprep.subr.mxu0 %v766_v1  ;;  %617 = vmatprep.subr.mxu1 %v766_v1 }
  0x4c   :  { %618 = vmatpush3.msra.mxu1 %v289_v40 }
  0x4d   :  { %619 = vmatprep.subr.mxu1 %v766_v1 }
  0xa3   :  { %v83_v43 = vpop.permute.xlu1 %82  ;;  %v77_v44 = vpop.permute.xlu0 %76 }
  0xa4   :  { %vm101_vm1 = vcmp.eq.s32.totalorder %v83_v43, %v74_v42  ;;  %vm99_vm2 = vcmp.eq.s32.totalorder %v77_v44, %v74_v42 }
  0xa5   :  { %v495_v45 = vsel %vm101_vm1, 1.0, %v766_v1  ;;  %v493_v46 = vsel %vm99_vm2, 1.0, %v766_v1 }
  0xa6   :  { %v135_v47 = vrot.slane %v495_v45, 4  ;;  %v123_v48 = vrot.slane %v493_v46, 4 }
  0xa7   :  { %v86_v49 = vpop.permute.xlu1 %85  ;;  %v80_v50 = vpop.permute.xlu0 %79 }
  0xa8   :  { %v136_v51 = vadd.f32 %v495_v45, %v135_v47  ;;  %v124_v52 = vadd.f32 %v493_v46, %v123_v48  ;;  %vm102_vm3 = vcmp.eq.s32.totalorder %v86_v49, %v74_v42  ;;  %vm100_vm4 = vcmp.eq.s32.totalorder %v80_v50, %v74_v42 }
  0xa9   :  { %v496_v53 = vsel %vm102_vm3, 1.0, %v766_v1  ;;  %v494_v54 = vsel %vm100_vm4, 1.0, %v766_v1 }
  0xaa   :  { %v137_v55 = vrot.slane %v136_v51, 2  ;;  %v125_v56 = vrot.slane %v124_v52, 2  ;;  %v141_v57 = vrot.slane %v496_v53, 4  ;;  %v129_v58 = vrot.slane %v494_v54, 4 }
  0xab   :  { %v92_v59 = vpop.permute.xlu1 %91  ;;  %v89_v60 = vpop.permute.xlu0 %88 }
  0xac   :  { %v138_v61 = vadd.f32 %v137_v55, %v136_v51  ;;  %v126_v62 = vadd.f32 %v125_v56, %v124_v52  ;;  %v142_v63 = vadd.f32 %v496_v53, %v141_v57  ;;  %v130_v0 = vadd.f32 %v494_v54, %v129_v58 }
  0xad   :  { %vm104_vm5 = vcmp.eq.s32.totalorder %v92_v59, %v74_v42  ;;  %vm103_vm6 = vcmp.eq.s32.totalorder %v89_v60, %v74_v42  ;;  %v288_v59 = vld [vmem:[#allocation5] sm:$0xff]  ;;  %v397_v60 = vld [vmem:[#allocation7 + $0x78] sm:$0xff] }
  0xae   :  { %v139_v2 = vrot.slane %v138_v61, 1  ;;  %v127_v3 = vrot.slane %v126_v62, 1  ;;  %v143_v4 = vrot.slane %v142_v63, 2  ;;  %v131_v5 = vrot.slane %v130_v0, 2  ;;  %620 = vmatpush3.msra.mxu1 %v288_v59 }
  0xaf   :  { %v498_v6 = vsel %vm104_vm5, 1.0, %v766_v1  ;;  %v497_v7 = vsel %vm103_vm6, 1.0, %v766_v1  ;;  %v98_v8 = vpop.permute.xlu1 %97  ;;  %v95_v9 = vpop.permute.xlu0 %94 }
  0xb0   :  { %v128_v10 = vadd.f32 %v127_v3, %v126_v62  ;;  %v144_v11 = vadd.f32 %v143_v4, %v142_v63  ;;  %v132_v12 = vadd.f32 %v131_v5, %v130_v0  ;;  %v153_v13 = vrot.slane %v498_v6, 4  ;;  %v395_v62 = vld [vmem:[#allocation7 + $0x68] sm:$0xff]  ;;  %v394_v63 = vld [vmem:[#allocation7 + $0x60] sm:$0xff]  ;;  %v393_v0 = vld [vmem:[#allocation7 + $0x58] sm:$0xff] }
  0xb1   :  { %v147_v14 = vrot.slane %v497_v7, 4  ;;  %vm106_vm7 = vcmp.eq.s32.totalorder %v98_v8, %v74_v42  ;;  %vm105_vm8 = vcmp.eq.s32.totalorder %v95_v9, %v74_v42  ;;  %v140_v15 = vadd.f32 %v139_v2, %v138_v61  ;;  %v396_v61 = vld [vmem:[#allocation7 + $0x70] sm:$0xff]  ;;  %v391_v3 = vld [vmem:[#allocation7 + $0x48] sm:$0xff] }
  0xb2   :  { %v145_v16 = vrot.slane %v144_v11, 1  ;;  %v133_v17 = vrot.slane %v132_v12, 1  ;;  %v154_v18 = vadd.f32 %v498_v6, %v153_v13  ;;  %v500_v20 = vsel %vm106_vm7, 1.0, %v766_v1  ;;  %v392_v2 = vld [vmem:[#allocation7 + $0x50] sm:$0xff]  ;;  %v390_v6 = vld [vmem:[#allocation7 + $0x40] sm:$0xff]  ;;  %v387_v9 = vld [vmem:[#allocation7 + $0x28] sm:$0xff] }
  0xb3   :  { %v148_v19 = vadd.f32 %v497_v7, %v147_v14  ;;  %v499_v21 = vsel %vm105_vm8, 1.0, %v766_v1  ;;  %v165_v23 = vrot.slane %v500_v20, 4  ;;  %v171_v25 = vmul.f32 0.125, %v128_v10  ;;  %v389_v7 = vld [vmem:[#allocation7 + $0x38] sm:$0xff]  ;;  %v388_v8 = vld [vmem:[#allocation7 + $0x30] sm:$0xff]  ;;  %v386_v10 = vld [vmem:[#allocation7 + $0x20] sm:$0xff] }
  0xb4   :  { %v134_v22 = vadd.f32 %v133_v17, %v132_v12  ;;  %v159_v24 = vrot.slane %v499_v21, 4  ;;  %v155_v26 = vrot.slane %v154_v18, 2  ;;  %v146_v28 = vadd.f32 %v145_v16, %v144_v11  ;;  %v385_v11 = vld [vmem:[#allocation7 + $0x18] sm:$0xff]  ;;  %v384_v12 = vld [vmem:[#allocation7 + $0x10] sm:$0xff]  ;;  %v383_v13 = vld [vmem:[#allocation7 + $0x8] sm:$0xff] }
  0xb5   :  { %v149_v27 = vrot.slane %v148_v19, 2  ;;  %v166_v30 = vadd.f32 %v500_v20, %v165_v23  ;;  %v173_v32 = vmul.f32 0.125, %v140_v15  ;;  %v382_v14 = vld [vmem:[#allocation7] sm:$0xff] }
  0xb6   :  { %v172_v29 = vmul.f32 0.125, %v134_v22  ;;  %v160_v31 = vadd.f32 %v499_v21, %v159_v24  ;;  %v156_v33 = vadd.f32 %v155_v26, %v154_v18  ;;  %v174_v41 = vmul.f32 0.125, %v146_v28  ;;  %v501_v15 = vld [vmem:[%s911_s3] ss:$0 sm:$0xff]  ;;  %s734_s3 = scalar_lea.vmem %s484_s7, 128 }
  0xb7   :  { %v150_v34 = vadd.f32 %v149_v27, %v148_v19  ;;  %v167_v36 = vrot.slane %v166_v30, 2  ;;  %v502_v20 = vld [vmem:[%s913_s5] ss:$0 sm:$0xff]  ;;  %p735_p1 = scmp.ne.s32.totalorder %s484_s7, %s734_s3  ;;  %p740_p3 = scmp.lt.s32.totalorder %s734_s3, %s734_s3 }
  0xb8   :  { %v204_v35 = vsel %vm203_vm9, %v172_v29, %v171_v25  ;;  %v161_v37 = vrot.slane %v160_v31, 2  ;;  %v157_v38 = vrot.slane %v156_v33, 1 }
  0xb9   :  { %v151_v39 = vrot.slane %v150_v34, 1  ;;  %v206_v40 = vsel %vm205_vm10, %v173_v32, %v204_v35  ;;  %v168_v42 = vadd.f32 %v167_v36, %v166_v30  ;;  %p741_p4 = por %p740_p3, %p739_p2 }
  0xba   :  { %v162_v43 = vadd.f32 %v161_v37, %v160_v31  ;;  %v158_v44 = vadd.f32 %v157_v38, %v156_v33  ;;  %v208_v48 = vsel %vm207_vm11, %v174_v41, %v206_v40 }
  0xbb   :  { %v152_v45 = vadd.f32 %v151_v39, %v150_v34  ;;  %v169_v46 = vrot.slane %v168_v42, 1  ;;  %p742_p5 = pnand %p741_p4, %p735_p1 }
  0xbc   :  { %v163_v47 = vrot.slane %v162_v43, 1  ;;  %v176_v49 = vmul.f32 0.125, %v158_v44 }
  0xbd   :  { %v175_v50 = vmul.f32 0.125, %v152_v45  ;;  %v170_v51 = vadd.f32 %v169_v46, %v168_v42 }
  0xbe   :  { %v164_v52 = vadd.f32 %v163_v47, %v162_v43 }
  0xbf   :  { %v210_v53 = vsel %vm209_vm12, %v175_v50, %v208_v48  ;;  %v178_v55 = vmul.f32 0.125, %v170_v51 }
  0xc0   :  { %v177_v54 = vmul.f32 0.125, %v164_v52  ;;  %v212_v56 = vsel %vm211_vm13, %v176_v49, %v210_v53 }
  0xc2   :  { %v214_v57 = vsel %vm213_vm14, %v177_v54, %v212_v56 }
  0xc3   :  { %v216_v58 = vsel %vm215_vm15, %v178_v55, %v214_v57 }
  0xc4   :  { %587 = vmatmul.mubr.f32.vlgmr.msra.gmra.mxu0 %v216_v58 }
  0xc5   :  { %656 = vmatprep.mubr.msk.f32.mxu0 %vm767_vm0, %v766_v1  ;;  %625 = vmatpush3.msra.mxu0 %v397_v60 }
  0xc6   :  { %626 = vmatprep.subr.mxu0 %v766_v1 }
  0xc7   :  { %627 = vmatpush3.msra.mxu0 %v396_v61 }
  0xc8   :  { %628 = vmatprep.subr.mxu0 %v766_v1 }
  0xc9   :  { %629 = vmatpush3.msra.mxu0 %v395_v62 }
  0xca   :  { %630 = vmatprep.subr.mxu0 %v766_v1 }
  0xcb   :  { %631 = vmatpush3.msra.mxu0 %v394_v63 }
  0xcc   :  { %632 = vmatprep.subr.mxu0 %v766_v1 }
  0xcd   :  { %633 = vmatpush3.msra.mxu0 %v393_v0 }
  0xce   :  { %634 = vmatprep.subr.mxu0 %v766_v1 }
  0xcf   :  { %635 = vmatpush3.msra.mxu0 %v392_v2 }
  0xd0   :  { %636 = vmatprep.subr.mxu0 %v766_v1 }
  0xd1   :  { %637 = vmatpush3.msra.mxu0 %v391_v3 }
  0xd2   :  { %638 = vmatprep.subr.mxu0 %v766_v1 }
  0xd3   :  { %639 = vmatpush3.msra.mxu0 %v390_v6 }
  0xd4   :  { %640 = vmatprep.subr.mxu0 %v766_v1 }
  0xd5   :  { %641 = vmatpush3.msra.mxu0 %v389_v7 }
  0xd6   :  { %642 = vmatprep.subr.mxu0 %v766_v1 }
  0xd7   :  { %643 = vmatpush3.msra.mxu0 %v388_v8 }
  0xd8   :  { %644 = vmatprep.subr.mxu0 %v766_v1 }
  0xd9   :  { %645 = vmatpush3.msra.mxu0 %v387_v9 }
  0xda   :  { %646 = vmatprep.subr.mxu0 %v766_v1 }
  0xdb   :  { %647 = vmatpush3.msra.mxu0 %v386_v10 }
  0xdc   :  { %648 = vmatprep.subr.mxu0 %v766_v1 }
  0xdd   :  { %649 = vmatpush3.msra.mxu0 %v385_v11 }
  0xde   :  { %650 = vmatprep.subr.mxu0 %v766_v1 }
  0xdf   :  { %651 = vmatpush3.msra.mxu0 %v384_v12 }
  0xe0   :  { %652 = vmatprep.subr.mxu0 %v766_v1 }
  0xe1   :  { %653 = vmatpush3.msra.mxu0 %v383_v13 }
  0xe2   :  { %654 = vmatprep.subr.mxu0 %v766_v1 }
  0xe3   :  { %655 = vmatpush3.msra.mxu0 %v382_v14 }
 0x184   :  { %v284_v4 = vpop.f32.mrf.mxu0 }
 0x185   :  { %622 = vmatmul.mubr.f32.vlgmr.msra.gmra.mxu1 %v284_v4 }
 0x186   :  { %v588_v5 = vpop.f32.mrf.mxu0 }
 0x245   :  { %v377_v16 = vpop.f32.mrf.mxu1 }
 0x246   :  { %v378_v17 = vadd.f32 %v501_v15, %v377_v16 }
 0x247   :  { %v623_v18 = vpop.f32.mrf.mxu1 }
 0x248   :  { %670 = vtanh.f32 %v378_v17 }
 0x255   :  { %v671_v19 = vpop.eup %670 }
 0x256   :  { %657 = vmatmul.mubr.f32.vlgmr.msra.gmra.mxu0 %v671_v19 }
 0x316   :  { %v471_v21 = vpop.f32.mrf.mxu0 }
 0x317   :  { %v472_v22 = vadd.f32 %v502_v20, %v471_v21 }
 0x318   :  { %v658_v23 = vpop.f32.mrf.mxu0 }
 0x319   :  { %672 = vtanh.f32 %v472_v22 }
 0x326   :  { %v673_v1 = vpop.eup %672 }
 0x327   :  { %476 = vst [vmem:[#allocation8] sm:$0xff] %v673_v1 }
 0x328   :  { %745 = shalt.err (!%p742_p5)
}
 0x329   :  { %486 = dma.vmem_to_hbm [thread:$0]  %s484_s7, 128, %s914_s6, [#allocation4]  }
 0x32a   :  { %758 = dma.done.wait [#allocation4], 128  }
 0x32b   :  { %759 = vsyncadd [#allocation4], 4294967168 }
 0x32c   :  { %490 = vsyncpa [#allocation3], 1 }
 0x32d   :  { %491 = vsyncpa [#allocation6], 1 }
 0x32e   :  { %492 = vsyncpa [#allocation4], 1 }

</bundles_post_ra>
